<compile_context>
chip_gen: v7x
topology: tpu7x:2x2x1
jax: 0.10.0
libtpu: 0.0.40
codegen_flags: <defaults>
</compile_context>

<pallas_src>
import functools

import jax
import jax.numpy as jnp
from jax import lax
from jax.experimental import pallas as pl
from jax.experimental.pallas import tpu as pltpu

_LANE = 128


def _round_up(n, m):
    return ((n + m - 1) // m) * m


def _vmem_budget():
    """(vmem_limit_bytes, physical_capacity) — generation aware, safe fallback."""
    cap = 64 << 20  # conservative default (v7x per-TC VMEM)
    try:
        info = pltpu.get_tpu_info()
        cap = int(getattr(info, "vmem_capacity_bytes", cap))
    except Exception:
        pass
    limit = min((cap * 3) // 4, 100 << 20)   # leave headroom for compiler scratch
    return limit, cap


def _pick_q_tile(s_pad, vmem_cap_bytes):
    # v5e/v6e (128 MiB VMEM): TQ=256 is fine; v7x (64 MiB): TQ=128 keeps the f32
    # sim/e/weights intermediates + double-buffered (TQ, Sp) weights output in budget.
    if vmem_cap_bytes > (96 << 20) and s_pad % 256 == 0:
        return 256
    return 128 if s_pad % 128 == 0 else s_pad


def _self_attention_kernel(x_ref, w_ref, b_ref, out_ref, weights_ref,
                           q_scr, kT_scr, v_scr, *, s_actual):
    # Block shapes:
    #   x_ref       (1, Sp, Dp)   bf16  (constant across q-tiles)
    #   w_ref       (Dp, 3Dp)     bf16  fused [s*Wq^T | Wk^T | Wv^T], zero padded
    #   b_ref       (1, 3Dp)      f32   fused [s*bq | bk | bv], zero padded
    #   out_ref     (1, TQ, Dp)   f32
    #   weights_ref (1, TQ, Sp)   f32
    #   q_scr (Sp,Dp) / kT_scr (Dp,Sp) / v_scr (Sp,Dp)   bf16 VMEM scratch (persist over qi)
    qi = pl.program_id(1)
    Sp = x_ref.shape[1]
    Dp = x_ref.shape[2]
    TQ = out_ref.shape[1]

    @pl.when(qi == 0)
    def _project_qkv():
        # Fused QKV projection for the whole (padded) sequence, once per batch element.
        x = x_ref[0]                                                       # (Sp, Dp) bf16
        qkv = jnp.dot(x, w_ref[...], preferred_element_type=jnp.float32)   # (Sp, 3Dp) f32
        qkv = qkv + b_ref[...]
        # 1/sqrt(dim) already folded into Wq / bq at fusion time.
        q_scr[...] = qkv[:, :Dp].astype(jnp.bfloat16)                      # (Sp, Dp)
        # Store K transposed once per batch -> per-tile QK matmul is [TQ,Dp]@[Dp,Sp].
        kT_scr[...] = qkv[:, Dp:2 * Dp].astype(jnp.bfloat16).T             # (Dp, Sp)
        v_scr[...] = qkv[:, 2 * Dp:].astype(jnp.bfloat16)                  # (Sp, Dp)

    row0 = pl.multiple_of(qi * TQ, TQ)
    q_t = q_scr[pl.ds(row0, TQ), :]                                        # (TQ, Dp) bf16

    sim = jnp.dot(q_t, kT_scr[...], preferred_element_type=jnp.float32)    # (TQ, Sp) f32

    if s_actual < Sp:
        # Mask padded key columns so softmax ignores them (padded rows of x carry the
        # k-bias, so they must be excluded explicitly).
        col = lax.broadcasted_iota(jnp.int32, (TQ, Sp), 1)
        sim = jnp.where(col < s_actual, sim, jnp.float32(-1e30))

    # Numerically-stable softmax in f32.  Exact reciprocal so returned weight rows sum
    # to 1 to float32 rounding (the approx EUP reciprocal broke the row-sum check).
    sim_max = jnp.max(sim, axis=-1, keepdims=True)
    e = jnp.exp(sim - sim_max)
    denom = jnp.sum(e, axis=-1, keepdims=True)
    weights = e * pl.reciprocal(denom, approx=False)                       # (TQ, Sp) f32

    out = jnp.dot(weights.astype(jnp.bfloat16), v_scr[...],
                  preferred_element_type=jnp.float32)                      # (TQ, Dp) f32

    out_ref[0] = out.astype(out_ref.dtype)
    weights_ref[0] = weights.astype(weights_ref.dtype)


def fuse_qkv_params(wq, wk, wv, bq, bk, bv, compute_dtype=jnp.bfloat16):
    """One-time prep (weight-load time, NOT per call):
    torch-layout (out,in) weights -> fused, scale-folded, lane-padded (Dp, 3Dp) bf16
    matrix + (1, 3Dp) f32 bias."""
    D = wq.shape[0]
    Dp = _round_up(D, _LANE)
    scale = 1.0 / (D ** 0.5)

    def pad_w(w):                    # (D, D) -> (Dp, Dp), zero padded
        return jnp.pad(w.astype(jnp.float32), ((0, Dp - D), (0, Dp - D)))

    def pad_b(b):                    # (D,) -> (Dp,)
        return jnp.pad(b.astype(jnp.float32), (0, Dp - D))

    w_qkv = jnp.concatenate([pad_w(wq.T * scale), pad_w(wk.T), pad_w(wv.T)],
                            axis=1).astype(compute_dtype)                   # (Dp, 3Dp)
    b_qkv = jnp.concatenate([pad_b(bq * scale), pad_b(bk), pad_b(bv)]
                            ).reshape(1, -1).astype(jnp.float32)             # (1, 3Dp)
    return w_qkv, b_qkv


@jax.jit
def self_attention(x, w_qkv, b_qkv):
    """x: (B, S, D) f32; w_qkv: (Dp, 3Dp) fused/padded bf16; b_qkv: (1, 3Dp) f32.
    Returns (out (B,S,D) f32, attention weights (B,S,S) f32) — matches the torch module."""
    B, S, D = x.shape
    Dp = w_qkv.shape[0]
    assert w_qkv.shape == (Dp, 3 * Dp) and b_qkv.shape == (1, 3 * Dp) and Dp >= D
    Sp = _round_up(S, _LANE)

    vmem_limit, vmem_cap = _vmem_budget()
    TQ = _pick_q_tile(Sp, vmem_cap)
    nq = Sp // TQ

    # Pad to lane-dense shapes and pre-cast to bf16 (halves x DMA + resident block).
    x_p = x
    if Sp != S or Dp != D:
        x_p = jnp.pad(x, ((0, 0), (0, Sp - S), (0, Dp - D)))
    x_p = x_p.astype(jnp.bfloat16)

    kernel = functools.partial(_self_attention_kernel, s_actual=S)

    grid_spec = pltpu.PrefetchScalarGridSpec(
        num_scalar_prefetch=0,
        grid=(B, nq),                                      # batch outer, q-tile inner
        in_specs=[
            pl.BlockSpec((1, Sp, Dp), lambda b, qi: (b, 0, 0)),      # x (resident over qi)
            pl.BlockSpec((Dp, 3 * Dp), lambda b, qi: (0, 0)),        # fused W_qkv (bf16)
            pl.BlockSpec((1, 3 * Dp), lambda b, qi: (0, 0)),         # fused bias (f32)
        ],
        out_specs=[
            pl.BlockSpec((1, TQ, Dp), lambda b, qi: (b, qi, 0)),     # out
            pl.BlockSpec((1, TQ, Sp), lambda b, qi: (b, qi, 0)),     # attention weights
        ],
        scratch_shapes=[
            pltpu.VMEM((Sp, Dp), jnp.bfloat16),            # q (scale folded into W)
            pltpu.VMEM((Dp, Sp), jnp.bfloat16),            # k^T (transposed once / batch)
            pltpu.VMEM((Sp, Dp), jnp.bfloat16),            # v
        ],
    )

    out_p, weights_p = pl.pallas_call(
        kernel,
        out_shape=(
            jax.ShapeDtypeStruct((B, Sp, Dp), jnp.float32),
            jax.ShapeDtypeStruct((B, Sp, Sp), jnp.float32),
        ),
        grid_spec=grid_spec,
        compiler_params=pltpu.CompilerParams(
            # q-tile axis carries projected K/V scratch -> "arbitrary"; batch is parallel.
            dimension_semantics=("parallel", "arbitrary"),
            vmem_limit_bytes=vmem_limit,
        ),
    )(x_p, w_qkv, b_qkv)

    # Strip the padding.
    return out_p[:, :S, :D], weights_p[:, :S, :S]


def _reference(x, wq, wk, wv, bq, bk, bv):
    q = jnp.einsum("bsd,ed->bse", x, wq) + bq
    k = jnp.einsum("bsd,ed->bse", x, wk) + bk
    v = jnp.einsum("bsd,ed->bse", x, wv) + bv
    sim = jnp.einsum("bqd,bkd->bqk", q, k) / (x.shape[-1] ** 0.5)
    w = jax.nn.softmax(sim, axis=-1)
    out = jnp.einsum("bqk,bkd->bqd", w, v)
    return out, w


if __name__ == "__main__":
    B, S, D = 2, 8, 32
    key = jax.random.PRNGKey(0)
    kx, kq, kk, kv, kbq, kbk, kbv = jax.random.split(key, 7)

    x = jax.random.normal(kx, (B, S, D), dtype=jnp.float32)
    # Deterministic "init" of the Linear layers (torch layout: weight (out, in)).
    bound = 1.0 / (D ** 0.5)
    wq = jax.random.uniform(kq, (D, D), minval=-bound, maxval=bound, dtype=jnp.float32)
    wk = jax.random.uniform(kk, (D, D), minval=-bound, maxval=bound, dtype=jnp.float32)
    wv = jax.random.uniform(kv, (D, D), minval=-bound, maxval=bound, dtype=jnp.float32)
    bq = jax.random.uniform(kbq, (D,), minval=-bound, maxval=bound, dtype=jnp.float32)
    bk = jax.random.uniform(kbk, (D,), minval=-bound, maxval=bound, dtype=jnp.float32)
    bv = jax.random.uniform(kbv, (D,), minval=-bound, maxval=bound, dtype=jnp.float32)

    # One-time param prep (fusion + transpose + scale fold + lane padding + bf16 cast).
    w_qkv, b_qkv = fuse_qkv_params(wq, wk, wv, bq, bk, bv)

    out, weights = self_attention(x, w_qkv, b_qkv)
    jax.block_until_ready((out, weights))

    ref_out, ref_w = _reference(x, wq, wk, wv, bq, bk, bv)
    # bf16 MXU operands (f32 accumulation) => loosened tolerances vs the f32 reference.
    assert jnp.allclose(out, ref_out, atol=3e-2, rtol=3e-2), \
        f"out mismatch: max abs err {jnp.max(jnp.abs(out - ref_out))}"
    assert jnp.allclose(weights, ref_w, atol=2e-2, rtol=2e-2), \
        f"weights mismatch: max abs err {jnp.max(jnp.abs(weights - ref_w))}"
    # Softmax rows must sum to ~1 (exact reciprocal + masked padded keys).
    assert jnp.allclose(jnp.sum(weights, axis=-1), 1.0, atol=1e-3)

    print("KERNEL_OK")
</pallas_src>

<mosaic_0001>
module attributes {stable_mosaic.version = 11 : i64} {
  func.func @_self_attention_kernel(%arg0: i32, %arg1: i32, %arg2: memref<1x128x128xbf16, #tpu.memory_space<vmem>>, %arg3: memref<128x384xbf16, #tpu.memory_space<vmem>>, %arg4: memref<1x384xf32, #tpu.memory_space<vmem>>, %arg5: memref<1x128x128xf32, #tpu.memory_space<vmem>>, %arg6: memref<1x128x128xf32, #tpu.memory_space<vmem>>, %arg7: memref<128x128xbf16, #tpu.memory_space<vmem>>, %arg8: memref<128x128xbf16, #tpu.memory_space<vmem>>, %arg9: memref<128x128xbf16, #tpu.memory_space<vmem>>) attributes {dimension_semantics = [#tpu.dimension_semantics<parallel>, #tpu.dimension_semantics<arbitrary>], iteration_bounds = array<i64: 2, 1>, scalar_prefetch = 0 : i64, scratch_operands = 3 : i64, tpu.core_type = #tpu.core_type<tc>, window_params = [{transform_indices = @transform_0, window_bounds = array<i64: 1, 128, 128>}, {pipeline_mode = #tpu.pipeline_mode<synchronous>, transform_indices = @transform_1, window_bounds = array<i64: 128, 384>}, {pipeline_mode = #tpu.pipeline_mode<synchronous>, transform_indices = @transform_2, window_bounds = array<i64: 1, 384>}, {transform_indices = @transform_3, window_bounds = array<i64: 1, 128, 128>}, {transform_indices = @transform_4, window_bounds = array<i64: 1, 128, 128>}]} {
    %c0_i32 = arith.constant 0 : i32
    %0 = arith.cmpi eq, %arg1, %c0_i32 : i32
    %1 = arith.extui %0 : i1 to i32
    %c0_i32_0 = arith.constant 0 : i32
    %2 = arith.cmpi ne, %1, %c0_i32_0 : i32
    scf.if %2 {
      %c0_15 = arith.constant 0 : index
      %c0_16 = arith.constant 0 : index
      %c0_17 = arith.constant 0 : index
      %33 = vector.load %arg2[%c0_15, %c0_16, %c0_17] : memref<1x128x128xbf16, #tpu.memory_space<vmem>>, vector<1x128x128xbf16>
      %34 = vector.shape_cast %33 : vector<1x128x128xbf16> to vector<128x128xbf16>
      %c0_18 = arith.constant 0 : index
      %c0_19 = arith.constant 0 : index
      %35 = vector.load %arg3[%c0_18, %c0_19] : memref<128x384xbf16, #tpu.memory_space<vmem>>, vector<128x384xbf16>
      %cst_20 = arith.constant dense<0.000000e+00> : vector<128x384xf32>
      %36 = tpu.matmul %34, %35, %cst_20 {dimension_numbers = #tpu.dot_dimension_numbers<[1], [0], [0], [1], [0, 0, 1, 1], [], []>} : vector<128x128xbf16>, vector<128x384xbf16>, vector<128x384xf32> -> vector<128x384xf32>
      %c0_21 = arith.constant 0 : index
      %c0_22 = arith.constant 0 : index
      %37 = vector.load %arg4[%c0_21, %c0_22] : memref<1x384xf32, #tpu.memory_space<vmem>>, vector<1x384xf32>
      %38 = vector.broadcast %37 : vector<1x384xf32> to vector<128x384xf32>
      %39 = arith.addf %36, %38 : vector<128x384xf32>
      %40 = vector.extract_strided_slice %39 {offsets = [0, 0], sizes = [128, 128], strides = [1, 1]} : vector<128x384xf32> to vector<128x128xf32>
      %41 = arith.truncf %40 : vector<128x128xf32> to vector<128x128xbf16>
      %c0_23 = arith.constant 0 : index
      %c0_24 = arith.constant 0 : index
      %42 = vector.load %arg7[%c0_23, %c0_24] : memref<128x128xbf16, #tpu.memory_space<vmem>>, vector<128x128xbf16>
      tpu.vector_store %arg7[%c0_23, %c0_24], %41 {strides = array<i32>} : memref<128x128xbf16, #tpu.memory_space<vmem>>, vector<128x128xbf16>,
      %43 = vector.extract_strided_slice %39 {offsets = [0, 128], sizes = [128, 128], strides = [1, 1]} : vector<128x384xf32> to vector<128x128xf32>
      %44 = arith.truncf %43 : vector<128x128xf32> to vector<128x128xbf16>
      %45 = tpu.transpose %44, [1, 0] : vector<128x128xbf16> -> vector<128x128xbf16>
      %c0_25 = arith.constant 0 : index
      %c0_26 = arith.constant 0 : index
      %46 = vector.load %arg8[%c0_25, %c0_26] : memref<128x128xbf16, #tpu.memory_space<vmem>>, vector<128x128xbf16>
      tpu.vector_store %arg8[%c0_25, %c0_26], %45 {strides = array<i32>} : memref<128x128xbf16, #tpu.memory_space<vmem>>, vector<128x128xbf16>,
      %47 = vector.extract_strided_slice %39 {offsets = [0, 256], sizes = [128, 128], strides = [1, 1]} : vector<128x384xf32> to vector<128x128xf32>
      %48 = arith.truncf %47 : vector<128x128xf32> to vector<128x128xbf16>
      %c0_27 = arith.constant 0 : index
      %c0_28 = arith.constant 0 : index
      %49 = vector.load %arg9[%c0_27, %c0_28] : memref<128x128xbf16, #tpu.memory_space<vmem>>, vector<128x128xbf16>
      tpu.vector_store %arg9[%c0_27, %c0_28], %48 {strides = array<i32>} : memref<128x128xbf16, #tpu.memory_space<vmem>>, vector<128x128xbf16>,
    } else {
    }
    %c128_i32 = arith.constant 128 : i32
    %3 = arith.muli %arg1, %c128_i32 : i32
    %4 = tpu.assume_multiple %3, 128 : i32
    %5 = arith.index_cast %4 : i32 to index
    %c0 = arith.constant 0 : index
    %6 = vector.load %arg7[%5, %c0] : memref<128x128xbf16, #tpu.memory_space<vmem>>, vector<128x128xbf16>
    %c0_1 = arith.constant 0 : index
    %c0_2 = arith.constant 0 : index
    %7 = vector.load %arg8[%c0_1, %c0_2] : memref<128x128xbf16, #tpu.memory_space<vmem>>, vector<128x128xbf16>
    %cst = arith.constant dense<0.000000e+00> : vector<128x128xf32>
    %8 = tpu.matmul %6, %7, %cst {dimension_numbers = #tpu.dot_dimension_numbers<[1], [0], [0], [1], [0, 0, 1, 1], [], []>} : vector<128x128xbf16>, vector<128x128xbf16>, vector<128x128xf32> -> vector<128x128xf32>
    %9 = tpu.iota {dimensions = array<i32: 1>} : vector<128x128xi32>
    %c8_i32 = arith.constant 8 : i32
    %10 = vector.broadcast %c8_i32 : i32 to vector<128x128xi32>
    %11 = arith.cmpi slt, %9, %10 : vector<128x128xi32>
    %cst_3 = arith.constant -1.000000e+30 : f32
    %12 = vector.broadcast %cst_3 : f32 to vector<128x128xf32>
    %13 = arith.select %11, %8, %12 : vector<128x128xi1>, vector<128x128xf32>
    %cst_4 = arith.constant dense<0xFF800000> : vector<128xf32>
    %14 = vector.multi_reduction <maximumf>, %13, %cst_4 [1] : vector<128x128xf32> to vector<128xf32>
    %15 = vector.shape_cast %14 : vector<128xf32> to vector<128x1xf32>
    %16 = vector.broadcast %15 : vector<128x1xf32> to vector<128x128xf32>
    %17 = arith.subf %13, %16 : vector<128x128xf32>
    %18 = math.exp %17 : vector<128x128xf32>
    %cst_5 = arith.constant dense<0.000000e+00> : vector<128xf32>
    %19 = vector.multi_reduction <add>, %18, %cst_5 [1] : vector<128x128xf32> to vector<128xf32>
    %20 = vector.shape_cast %19 : vector<128xf32> to vector<128x1xf32>
    %21 = tpu.reciprocal %20 : vector<128x1xf32> -> vector<128x1xf32>
    %22 = vector.broadcast %21 : vector<128x1xf32> to vector<128x128xf32>
    %23 = arith.mulf %18, %22 : vector<128x128xf32>
    %24 = arith.truncf %23 : vector<128x128xf32> to vector<128x128xbf16>
    %c0_6 = arith.constant 0 : index
    %c0_7 = arith.constant 0 : index
    %25 = vector.load %arg9[%c0_6, %c0_7] : memref<128x128xbf16, #tpu.memory_space<vmem>>, vector<128x128xbf16>
    %cst_8 = arith.constant dense<0.000000e+00> : vector<128x128xf32>
    %26 = tpu.matmul %24, %25, %cst_8 {dimension_numbers = #tpu.dot_dimension_numbers<[1], [0], [0], [1], [0, 0, 1, 1], [], []>} : vector<128x128xbf16>, vector<128x128xbf16>, vector<128x128xf32> -> vector<128x128xf32>
    %c0_9 = arith.constant 0 : index
    %c0_10 = arith.constant 0 : index
    %c0_11 = arith.constant 0 : index
    %27 = vector.load %arg5[%c0_9, %c0_10, %c0_11] : memref<1x128x128xf32, #tpu.memory_space<vmem>>, vector<1x128x128xf32>
    %28 = vector.shape_cast %27 : vector<1x128x128xf32> to vector<128x128xf32>
    %29 = vector.shape_cast %26 : vector<128x128xf32> to vector<1x128x128xf32>
    tpu.vector_store %arg5[%c0_9, %c0_10, %c0_11], %29 {strides = array<i32>} : memref<1x128x128xf32, #tpu.memory_space<vmem>>, vector<1x128x128xf32>,
    %c0_12 = arith.constant 0 : index
    %c0_13 = arith.constant 0 : index
    %c0_14 = arith.constant 0 : index
    %30 = vector.load %arg6[%c0_12, %c0_13, %c0_14] : memref<1x128x128xf32, #tpu.memory_space<vmem>>, vector<1x128x128xf32>
    %31 = vector.shape_cast %30 : vector<1x128x128xf32> to vector<128x128xf32>
    %32 = vector.shape_cast %23 : vector<128x128xf32> to vector<1x128x128xf32>
    tpu.vector_store %arg6[%c0_12, %c0_13, %c0_14], %32 {strides = array<i32>} : memref<1x128x128xf32, #tpu.memory_space<vmem>>, vector<1x128x128xf32>,
    return
  }
  func.func @transform_0(%arg0: i32, %arg1: i32) -> (i32, i32, i32) {
    %c0_i32 = arith.constant 0 : i32
    %c0_i32_0 = arith.constant 0 : i32
    %c0_i32_1 = arith.constant 0 : i32
    return %arg0, %c0_i32, %c0_i32_0 : i32, i32, i32
  }
  func.func @transform_1(%arg0: i32, %arg1: i32) -> (i32, i32) {
    %c0_i32 = arith.constant 0 : i32
    %c0_i32_0 = arith.constant 0 : i32
    %c0_i32_1 = arith.constant 0 : i32
    return %c0_i32, %c0_i32_0 : i32, i32
  }
  func.func @transform_2(%arg0: i32, %arg1: i32) -> (i32, i32) {
    %c0_i32 = arith.constant 0 : i32
    %c0_i32_0 = arith.constant 0 : i32
    %c0_i32_1 = arith.constant 0 : i32
    return %c0_i32, %c0_i32_0 : i32, i32
  }
  func.func @transform_3(%arg0: i32, %arg1: i32) -> (i32, i32, i32) {
    %c0_i32 = arith.constant 0 : i32
    %c0_i32_0 = arith.constant 0 : i32
    return %arg0, %arg1, %c0_i32 : i32, i32, i32
  }
  func.func @transform_4(%arg0: i32, %arg1: i32) -> (i32, i32, i32) {
    %c0_i32 = arith.constant 0 : i32
    %c0_i32_0 = arith.constant 0 : i32
    return %arg0, %arg1, %c0_i32 : i32, i32, i32
  }
}

</mosaic_0001>

<bundles_post_ra>
// kernel: self_attention.1
= control target key start
LH: loop header
LB: loop body
LE: loop exit
PB: predicated region body
PF: predicated region fallthrough
CT: control target
= control target key end

     0   :  { %10 = vsyncpa [#allocation6], 0  ;;  %s1788_s15 = smov 0   ;;  %s1790_s16 = smov 0   ;;  %s2181_s0 = inlined_call_operand.vmem [shape: bf16[2,128,128], index: 0, kind: input, shape index: {}]   ;;  %s2182_s1 = inlined_call_operand.hbm [shape: bf16[128,384], index: 1, kind: input, shape index: {}]   ;;  %s2183_s2 = inlined_call_operand.vmem [shape: f32[1,384], index: 2, kind: input, shape index: {}]   ;;  %s2184_s3 = inlined_call_operand.vmem [shape: f32[2,128,128], index: 3, kind: output, shape index: {0}]   ;;  %s2185_s4 = inlined_call_operand.vmem [shape: f32[2,128,128], index: 4, kind: output, shape index: {1}]  }
   0x1   :  { %s1792_s17 = smov 0  }
   0x2 LB: > { %s1351_s18 = sadd.s32 4294967295, %s1757_s17   ;;  %s28_s19 = sadd.s32 1, %s1753_s16  ;;  %s1757_s17 = sphi %s1792_s17, %s16_s17   ;;  %s1753_s16 = sphi %s1790_s16, %s2195_s16   ;;  %s1749_s15 = sphi %s1788_s15, %s2194_s15  }
   0x3   : > { %p30_p0 = scmp.ge.s32.totalorder %s28_s19, 2  ;;  %p1353_p1 = scmp.ge.s32.totalorder %s1757_s17, 1 }
   0x4   : > { %p157_p2 = scmp.lt.s32.totalorder %s1757_s17, 3  ;;  %p1813_p4 = scmp.eq.s32.totalorder %s1351_s18, 0 }
   0x5   : > { %s2197_s19 = smov (%p30_p0, %s28_s19), 0  ;;  %s1759_s22 = smov [#allocation5]  }
   0x6   : > { %p1809_p3 = pnand %p1353_p1, %p157_p2  ;;  %s169_s23 = sshll.u32 %s1759_s22, 4  ;;  %s170_s23 = int_to_ptr.vmem [resolvable:$true] %s169_s23 }
   0x7   : > { %s2190_s21 = scalar_select %p1813_p4, 1, 0 }
   0x8   : > { %s2189_s20 = scalar_select %p1809_p3, 1, 0 }
   0x9   : > { %p1565_p5 = pneg %p1809_p3  ;;  %s1703_s27 = scalar_lea.hbm %s2182_s1, 3072 }
   0xa   : > { %p1704_p7 = scmp.ne.s32.totalorder %s2182_s1, %s1703_s27  ;;  %p1710_p11 = scmp.lt.u32.totalorder %s1703_s27, %s2182_s1 }
   0xb   : > { %p1821_p6 = pnand %p1813_p4, %p1565_p5 }
   0xd   : > { %p1705_p8 = pneg %p1821_p6 }
   0xf   : > { %p1706_p9 = pnand %p1705_p8, %p1704_p7 }
  0x11   : > { %p1707_p10 = pneg %p1706_p9 }
  0x13   : > { %p1712_p12 = pnand %p1710_p11, %p1707_p10 }
  0x15   : > { %1715 = shalt.err (!%p1712_p12)
}
  0x16   : > { %s1716_s6 = scalar_lea.vmem %s170_s23, 3072  ;;  %p1724_p2 = scmp.lt.s32.totalorder %s170_s23, %s170_s23 }
  0x17   : > { %p1717_p13 = scmp.ne.s32.totalorder %s170_s23, %s1716_s6  ;;  %p1725_p5 = scmp.lt.s32.totalorder %s1716_s6, %s1716_s6 }
  0x19   : > { %p1719_p0 = pnand %p1717_p13, %p1705_p8  ;;  %p1726_p4 = por %p1725_p5, %p1724_p2 }
  0x1b   : > { %p1720_p1 = pneg %p1719_p0 }
  0x1d   : > { %p1727_p3 = pnand %p1726_p4, %p1720_p1 }
  0x1f   : > { %1730 = shalt.err (!%p1727_p3)
}
  0x20   : > { %s1760_s7 = smov 192   ;;  %s1761_s8 = smov 12  }
  0x21   : > { %1568 = dma.hbm_to_vmem [thread:$0]  (!%p1821_p6), %s2182_s1, 3072, %s170_s23, [#allocation6], %s1760_s7, %s1760_s7, %s1761_s8  }
  0x22   : > { %p2192_p7 = scmp.ne.s32.totalorder %s2189_s20, 0 }
  0x23   : > { %p2193_p9 = scmp.ne.s32.totalorder (!%p2192_p7), %s2190_s21, 0 }
  0x24   : > { %196 = sbr.rel (%p2192_p7) target bundleno = 1251 (0x4e3), region = 32 }
  0x2b   : > { %1744 = dma.done.wait (%p2193_p9), [#allocation6], 3072  }
  0x2c   : > { %1746 = vsyncadd (%p2193_p9), [#allocation6], 4294964224  ;;  %v1762_v0 = vmov 0   ;;  %p235_p3 = scmp.lt.s32.totalorder %s1749_s15, 1  ;;  %v1599_v1 = vld [vmem:[#allocation5 + $0x4] ss:$12 sps:$4 sm:$0xff]   ;;  %v315_v33 = vlaneseq }
  0x2d   : > { %538 = vmatprep.mubr.bf16.mxu0 %v1762_v0  ;;  %v1601_v2 = vld [vmem:[#allocation5] ss:$12 sps:$4 sm:$0xff]   ;;  %506 = vmatprep.subr.bf16.mxu0 %v1599_v1  ;;  %v1602_v3 = vld [vmem:[#allocation5 + $0x1c] ss:$12 sps:$4 sm:$0xff]   ;;  %v1604_v4 = vld [vmem:[#allocation5 + $0x18] ss:$12 sps:$4 sm:$0xff]  }
  0x2e   : > { %s2199_s15 = smov (!%p235_p3, %s1749_s15), 1  ;;  %507 = vmatpush1.bf16.msra.mxu0 %v1601_v2  ;;  %v1605_v5 = vld [vmem:[#allocation5 + $0x34] ss:$12 sps:$4 sm:$0xff]   ;;  %v1607_v6 = vld [vmem:[#allocation5 + $0x30] ss:$12 sps:$4 sm:$0xff]   ;;  %v1874_v34 = vshrl.u32 %v315_v33, 7 }
  0x2f   : > { %508 = vmatprep.subr.bf16.mxu0 %v1602_v3  ;;  %s1398_s11 = sshll.u32 %s2199_s15, 6  ;;  %v1608_v7 = vld [vmem:[#allocation5 + $0x4c] ss:$12 sps:$4 sm:$0xff]   ;;  %v1610_v8 = vld [vmem:[#allocation5 + $0x48] ss:$12 sps:$4 sm:$0xff]   ;;  %s1399_s21 = sshll.u32 %s2199_s15, 7 }
  0x30   : > { %s1856_s14 = scalar_lea.vmem %s2181_s0, %s1398_s11  ;;  %v1611_v10 = vld [vmem:[#allocation5 + $0x64] ss:$12 sps:$4 sm:$0xff]   ;;  %v1613_v11 = vld [vmem:[#allocation5 + $0x60] ss:$12 sps:$4 sm:$0xff]   ;;  %v1614_v12 = vld [vmem:[#allocation5 + $0x7c] ss:$12 sps:$4 sm:$0xff]   ;;  %s2115_s24 = scalar_lea.vmem %s2185_s4, %s1399_s21 }
  0x31   : > { %v1623_v9 = vld [vmem:[%s1856_s14] sm:$0xff]   ;;  %v1631_v15 = vld [vmem:[#allocation5 + $0x8] ss:$12 sps:$4 sm:$0xff]   ;;  %v1619_v17 = vld [vmem:[#allocation5 + $0x90] ss:$12 sps:$4 sm:$0xff]   ;;  %v317_v35 = vsub.s32 0, %v1874_v34  ;;  %s2154_s27 = scalar_lea.vmem %s2184_s3, %s1399_s21 }
  0x32   : > { %509 = vmatpush1.bf16.msra.mxu0 %v1604_v4  ;;  %1465 = vmatprep.mubr.bf16.mxu1 %v1623_v9  ;;  %v1616_v13 = vld [vmem:[#allocation5 + $0x78] ss:$12 sps:$4 sm:$0xff]   ;;  %v1617_v14 = vld [vmem:[#allocation5 + $0x94] ss:$12 sps:$4 sm:$0xff]   ;;  %v1634_v21 = vld [vmem:[#allocation5 + $0x50] ss:$12 sps:$4 sm:$0xff]  }
  0x33   : > { %510 = vmatprep.subr.bf16.mxu0 %v1605_v5  ;;  %v1632_v16 = vld [vmem:[#allocation5 + $0x20] ss:$12 sps:$4 sm:$0xff]   ;;  %1449 = vmatprep.subr.bf16.mxu1 %v1631_v15  ;;  %v1633_v18 = vld [vmem:[#allocation5 + $0x38] ss:$12 sps:$4 sm:$0xff]   ;;  %v1622_v20 = vld [vmem:[#allocation5 + $0xa8] ss:$12 sps:$4 sm:$0xff]  }
  0x34   : > { %1450 = vmatpush3.bf16.msra.mxu1 %v1631_v15  ;;  %v1620_v19 = vld [vmem:[#allocation5 + $0xac] ss:$12 sps:$4 sm:$0xff]   ;;  %v1635_v22 = vld [vmem:[#allocation5 + $0x68] ss:$12 sps:$4 sm:$0xff]   ;;  %v1638_v26 = vld [vmem:[#allocation5 + $0xb0] ss:$12 sps:$4 sm:$0xff]  }
  0x35   : > { %1451 = vmatprep.subr.bf16.mxu1 %v1632_v16  ;;  %v1636_v23 = vld [vmem:[#allocation5 + $0x80] ss:$12 sps:$4 sm:$0xff]   ;;  %v1637_v25 = vld [vmem:[#allocation5 + $0x98] ss:$12 sps:$4 sm:$0xff]   ;;  %v1625_v27 = vld [vmem:[%s1856_s14 + $0x10] sm:$0xff]   ;;  %v321_v37 = vsub.s32 1, %v1874_v34 }
  0x36   : > { %511 = vmatpush1.bf16.msra.mxu0 %v1607_v6  ;;  %v1624_v24 = vld [vmem:[%s1856_s14 + $0x8] sm:$0xff]   ;;  %v1626_v28 = vld [vmem:[%s1856_s14 + $0x18] sm:$0xff]   ;;  %v1627_v29 = vld [vmem:[%s1856_s14 + $0x20] sm:$0xff]  }
  0x37   : > { %512 = vmatprep.subr.bf16.mxu0 %v1608_v7  ;;  %v1628_v30 = vld [vmem:[%s1856_s14 + $0x28] sm:$0xff]   ;;  %v1629_v31 = vld [vmem:[%s1856_s14 + $0x30] sm:$0xff]   ;;  %v1630_v32 = vld [vmem:[%s1856_s14 + $0x38] sm:$0xff]  }
  0x38   : > { %1452 = vmatpush3.bf16.msra.mxu1 %v1632_v16  ;;  %v1880_v36 = vld [vmem:[%s2183_s2] sm:$0x7] }
  0x39   : > { %1453 = vmatprep.subr.bf16.mxu1 %v1633_v18  ;;  %v1884_v38 = vrot.slane %v1880_v36, %v317_v35  ;;  %v1887_v40 = vrot.slane %v1880_v36, %v321_v37 }
  0x3a   : > { %513 = vmatpush1.bf16.msra.mxu0 %v1610_v8 }
  0x3b   : > { %514 = vmatprep.subr.bf16.mxu0 %v1611_v10 }
  0x3c   : > { %1454 = vmatpush3.bf16.msra.mxu1 %v1633_v18 }
  0x3d   : > { %1455 = vmatprep.subr.bf16.mxu1 %v1634_v21 }
  0x3e   : > { %515 = vmatpush1.bf16.msra.mxu0 %v1613_v11 }
  0x3f   : > { %516 = vmatprep.subr.bf16.mxu0 %v1614_v12 }
  0x40   : > { %1456 = vmatpush3.bf16.msra.mxu1 %v1634_v21 }
  0x41   : > { %1457 = vmatprep.subr.bf16.mxu1 %v1635_v22 }
  0x42   : > { %517 = vmatpush1.bf16.msra.mxu0 %v1616_v13 }
  0x43   : > { %518 = vmatprep.subr.bf16.mxu0 %v1617_v14 }
  0x44   : > { %1458 = vmatpush3.bf16.msra.mxu1 %v1635_v22 }
  0x45   : > { %1459 = vmatprep.subr.bf16.mxu1 %v1636_v23 }
  0x46   : > { %519 = vmatpush1.bf16.msra.mxu0 %v1619_v17 }
  0x47   : > { %520 = vmatprep.subr.bf16.mxu0 %v1620_v19 }
  0x48   : > { %1460 = vmatpush3.bf16.msra.mxu1 %v1636_v23 }
  0x49   : > { %1461 = vmatprep.subr.bf16.mxu1 %v1637_v25 }
  0x4a   : > { %521 = vmatpush1.bf16.msra.mxu0 %v1622_v20 }
  0x4c   : > { %1462 = vmatpush3.bf16.msra.mxu1 %v1637_v25 }
  0x4d   : > { %539 = vmatmul.mubr.bf16.vlgmr.msra.gmra.mrb[0].mxu0 %v1623_v9  ;;  %1463 = vmatprep.subr.bf16.mxu1 %v1638_v26 }
  0x4e   : > { %548 = vmatprep.mubr.bf16.mxu0 %v1762_v0 }
  0x50   : > { %1464 = vmatpush3.bf16.msra.mxu1 %v1638_v26 }
  0x53   : > { %1466 = vmatmul.mubr.bf16.vlgmr.msra.gmra.mrb[0].mxu1 %v1624_v24 }
  0x54   : > { %1469 = vmatprep.mubr.bf16.mxu1 %v1625_v27 }
  0x55   : > { %549 = vmatmul.mubr.bf16.gmra.mrb[4].mxu0 %v1624_v24 }
  0x56   : > { %558 = vmatprep.mubr.bf16.mxu0 %v1762_v0 }
  0x5b   : > { %1470 = vmatmul.mubr.bf16.gmra.mrb[4].mxu1 %v1626_v28 }
  0x5c   : > { %1473 = vmatprep.mubr.bf16.mxu1 %v1627_v29 }
  0x5d   : > { %559 = vmatmul.mubr.bf16.gmra.mrb[8].mxu0 %v1625_v27 }
  0x5e   : > { %568 = vmatprep.mubr.bf16.mxu0 %v1762_v0 }
  0x63   : > { %1474 = vmatmul.mubr.bf16.gmra.mrb[8].mxu1 %v1628_v30 }
  0x64   : > { %1477 = vmatprep.mubr.bf16.mxu1 %v1629_v31 }
  0x65   : > { %569 = vmatmul.mubr.bf16.gmra.mrb[12].mxu0 %v1626_v28 }
  0x66   : > { %578 = vmatprep.mubr.bf16.mxu0 %v1762_v0 }
  0x6b   : > { %1478 = vmatmul.mubr.bf16.gmra.mrb[12].mxu1 %v1630_v32 }
  0x6d   : > { %579 = vmatmul.mubr.bf16.gmra.mrb[16].mxu0 %v1627_v29 }
  0x6e   : > { %588 = vmatprep.mubr.bf16.mxu0 %v1762_v0 }
  0x75   : > { %589 = vmatmul.mubr.bf16.gmra.mrb[20].mxu0 %v1628_v30 }
  0x76   : > { %598 = vmatprep.mubr.bf16.mxu0 %v1762_v0 }
  0x7d   : > { %599 = vmatmul.mubr.bf16.gmra.mrb[24].mxu0 %v1629_v31 }
  0x7e   : > { %608 = vmatprep.mubr.bf16.mxu0 %v1762_v0 }
  0x85   : > { %609 = vmatmul.mubr.bf16.gmra.mrb[28].mxu0 %v1630_v32 }
 0x120   : > { %v540_v39 = vpop.f32.mrb[0].mxu0 }
 0x121   : > { %v542_v41 = vpop.f32.mrb[1].mxu0  ;;  %v541_v43 = vadd.f32 %v540_v39, %v1884_v38 }
 0x122   : > { %v544_v42 = vpop.f32.mrb[2].mxu0  ;;  %v543_v46 = vadd.f32 %v542_v41, %v1887_v40 }
 0x123   : > { %v545_v44 = vadd.f32 %v544_v42, %v1884_v38  ;;  %v546_v45 = vpop.f32.mrb[3].mxu0 }
 0x124   : > { %v547_v47 = vadd.f32 %v546_v45, %v1887_v40 }
 0x125   : > { %v716_v48 = vpack.c.bf16 %v545_v44, %v541_v43 }
 0x126   : > { %v732_v49 = vpack.c.bf16 %v547_v47, %v543_v46 }
 0x127   : > { %1497 = vmatprep.mubr.bf16.mxu1 %v716_v48 }
 0x128   : > { %v550_v50 = vpop.f32.mrb[4].mxu0  ;;  %740 = vxpose.xlu0.c.b16.start [1/8] %v732_v49, 128 }
 0x129   : > { %v1894_v51 = vadd.f32 %v550_v50, %v1884_v38  ;;  %v552_v52 = vpop.f32.mrb[5].mxu0 }
 0x12a   : > { %v554_v53 = vpop.f32.mrb[6].mxu0  ;;  %v553_v56 = vadd.f32 %v552_v52, %v1887_v40 }
 0x12b   : > { %v1897_v54 = vadd.f32 %v554_v53, %v1884_v38  ;;  %v556_v55 = vpop.f32.mrb[7].mxu0 }
 0x12c   : > { %v557_v57 = vadd.f32 %v556_v55, %v1887_v40 }
 0x12d   : > { %v717_v58 = vpack.c.bf16 %v1897_v54, %v1894_v51  ;;  %v899_v51 = vand.u32 127, %v315_v33 }
 0x12e   : > { %v733_v59 = vpack.c.bf16 %v557_v57, %v553_v56 }
 0x12f   : > { %vm900_vm0 = vcmp.lt.s32.totalorder %v899_v51, 8 }
 0x130   : > { %v560_v60 = vpop.f32.mrb[8].mxu0  ;;  %741 = vxpose.xlu0.c.b16.cont [2/8] %v733_v59, 128 }
 0x131   : > { %v1904_v61 = vadd.f32 %v560_v60, %v1884_v38  ;;  %v562_v62 = vpop.f32.mrb[9].mxu0 }
 0x132   : > { %v564_v63 = vpop.f32.mrb[10].mxu0  ;;  %v563_v2 = vadd.f32 %v562_v62, %v1887_v40 }
 0x133   : > { %v1907_v0 = vadd.f32 %v564_v63, %v1884_v38  ;;  %v566_v1 = vpop.f32.mrb[11].mxu0 }
 0x134   : > { %v567_v3 = vadd.f32 %v566_v1, %v1887_v40 }
 0x135   : > { %v718_v4 = vpack.c.bf16 %v1907_v0, %v1904_v61 }
 0x136   : > { %v734_v5 = vpack.c.bf16 %v567_v3, %v563_v2  ;;  %v325_v2 = vsub.s32 2, %v1874_v34  ;;  %v1467_v3 = vpop.f32.mrb[0].mxu1 }
 0x138   : > { %v570_v6 = vpop.f32.mrb[12].mxu0  ;;  %742 = vxpose.xlu0.c.b16.cont [3/8] %v734_v5, 128  ;;  %v653_v5 = vpop.f32.mrb[1].mxu1 }
 0x139   : > { %v1914_v7 = vadd.f32 %v570_v6, %v1884_v38  ;;  %v572_v8 = vpop.f32.mrb[13].mxu0  ;;  %v326_v6 = vrot.slane %v1880_v36, %v325_v2 }
 0x13a   : > { %v574_v9 = vpop.f32.mrb[14].mxu0  ;;  %v573_v12 = vadd.f32 %v572_v8, %v1887_v40  ;;  %v1468_v8 = vpop.f32.mrb[2].mxu1 }
 0x13b   : > { %v1917_v10 = vadd.f32 %v574_v9, %v1884_v38  ;;  %v576_v11 = vpop.f32.mrb[15].mxu0  ;;  %v656_v9 = vpop.f32.mrb[3].mxu1 }
 0x13c   : > { %v577_v13 = vadd.f32 %v576_v11, %v1887_v40  ;;  %v654_v11 = vadd.f32 %v653_v5, %v326_v6 }
 0x13d   : > { %v719_v14 = vpack.c.bf16 %v1917_v10, %v1914_v7 }
 0x13e   : > { %v735_v15 = vpack.c.bf16 %v577_v13, %v573_v12  ;;  %v665_v12 = vadd.f32 %v1468_v8, %v326_v6  ;;  %v657_v13 = vadd.f32 %v656_v9, %v326_v6 }
 0x140   : > { %v580_v16 = vpop.f32.mrb[16].mxu0  ;;  %743 = vxpose.xlu0.c.b16.cont [4/8] %v735_v15, 128  ;;  %v1471_v15 = vpop.f32.mrb[4].mxu1 }
 0x141   : > { %v1924_v17 = vadd.f32 %v580_v16, %v1884_v38  ;;  %v582_v18 = vpop.f32.mrb[17].mxu0  ;;  %v678_v16 = vadd.f32 %v1471_v15, %v326_v6 }
 0x142   : > { %v584_v19 = vpop.f32.mrb[18].mxu0  ;;  %v583_v22 = vadd.f32 %v582_v18, %v1887_v40 }
 0x143   : > { %v1927_v20 = vadd.f32 %v584_v19, %v1884_v38  ;;  %v586_v21 = vpop.f32.mrb[19].mxu0  ;;  %v1967_v19 = vpack.c.bf16 %v657_v13, %v654_v11 }
 0x144   : > { %v587_v23 = vadd.f32 %v586_v21, %v1887_v40 }
 0x145   : > { %v720_v24 = vpack.c.bf16 %v1927_v20, %v1924_v17  ;;  %1513 = vmatprep.subr.bf16.mxu0 %v1967_v19 }
 0x146   : > { %v736_v25 = vpack.c.bf16 %v587_v23, %v583_v22  ;;  %1514 = vmatpush3.bf16.msra.mxu0 %v1967_v19 }
 0x148   : > { %v590_v26 = vpop.f32.mrb[20].mxu0  ;;  %744 = vxpose.xlu0.c.b16.cont [5/8] %v736_v25, 128 }
 0x149   : > { %v1934_v27 = vadd.f32 %v590_v26, %v1884_v38  ;;  %v592_v28 = vpop.f32.mrb[21].mxu0 }
 0x14a   : > { %v594_v29 = vpop.f32.mrb[22].mxu0  ;;  %v593_v32 = vadd.f32 %v592_v28, %v1887_v40 }
 0x14b   : > { %v1937_v30 = vadd.f32 %v594_v29, %v1884_v38  ;;  %v596_v31 = vpop.f32.mrb[23].mxu0 }
 0x14c   : > { %v597_v35 = vadd.f32 %v596_v31, %v1887_v40 }
 0x14d   : > { %v721_v37 = vpack.c.bf16 %v1937_v30, %v1934_v27 }
 0x14e   : > { %v737_v39 = vpack.c.bf16 %v597_v35, %v593_v32 }
 0x150   : > { %v600_v41 = vpop.f32.mrb[24].mxu0  ;;  %745 = vxpose.xlu0.c.b16.cont [6/8] %v737_v39, 128 }
 0x151   : > { %v1944_v42 = vadd.f32 %v600_v41, %v1884_v38  ;;  %v602_v43 = vpop.f32.mrb[25].mxu0 }
 0x152   : > { %v604_v44 = vpop.f32.mrb[26].mxu0  ;;  %v603_v47 = vadd.f32 %v602_v43, %v1887_v40 }
 0x153   : > { %v1947_v45 = vadd.f32 %v604_v44, %v1884_v38  ;;  %v606_v46 = vpop.f32.mrb[27].mxu0 }
 0x154   : > { %v607_v48 = vadd.f32 %v606_v46, %v1887_v40 }
 0x155   : > { %v722_v49 = vpack.c.bf16 %v1947_v45, %v1944_v42 }
 0x156   : > { %v738_v50 = vpack.c.bf16 %v607_v48, %v603_v47 }
 0x158   : > { %v610_v52 = vpop.f32.mrb[28].mxu0  ;;  %746 = vxpose.xlu0.c.b16.cont [7/8] %v738_v50, 128 }
 0x159   : > { %v1954_v53 = vadd.f32 %v610_v52, %v1884_v38  ;;  %v612_v55 = vpop.f32.mrb[29].mxu0 }
 0x15a   : > { %v614_v56 = vpop.f32.mrb[30].mxu0  ;;  %v613_v60 = vadd.f32 %v612_v55, %v1887_v40 }
 0x15b   : > { %v1957_v57 = vadd.f32 %v614_v56, %v1884_v38  ;;  %v616_v59 = vpop.f32.mrb[31].mxu0  ;;  %v662_v38 = vadd.f32 %v1467_v3, %v326_v6 }
 0x15c   : > { %v617_v62 = vadd.f32 %v616_v59, %v1887_v40  ;;  %v669_v40 = vpop.f32.mrb[5].mxu1 }
 0x15d   : > { %v723_v63 = vpack.c.bf16 %v1957_v57, %v1954_v53  ;;  %v1965_v18 = vpack.c.bf16 %v665_v12, %v662_v38  ;;  %v670_v21 = vadd.f32 %v669_v40, %v326_v6  ;;  %v1472_v22 = vpop.f32.mrb[6].mxu1 }
 0x15e   : > { %v739_v1 = vpack.c.bf16 %v617_v62, %v613_v60  ;;  %v681_v34 = vadd.f32 %v1472_v22, %v326_v6  ;;  %v672_v23 = vpop.f32.mrb[7].mxu1 }
 0x15f   : > { %v673_v36 = vadd.f32 %v672_v23, %v326_v6  ;;  %v1475_v25 = vpop.f32.mrb[8].mxu1  ;;  %1515 = vmatprep.subr.bf16.mxu0 %v1965_v18 }
 0x160   : > { %747 = vxpose.xlu0.c.b16.end [8/8] %v739_v1, 128  ;;  %v1971_v26 = vpack.c.bf16 %v681_v34, %v678_v16  ;;  %v694_v28 = vadd.f32 %v1475_v25, %v326_v6  ;;  %v685_v29 = vpop.f32.mrb[9].mxu1  ;;  %1516 = vmatpush3.bf16.msra.mxu0 %v1965_v18 }
 0x161   : > { %v1973_v31 = vpack.c.bf16 %v673_v36, %v670_v21  ;;  %v686_v32 = vadd.f32 %v685_v29, %v326_v6  ;;  %v1476_v35 = vpop.f32.mrb[10].mxu1 }
 0x162   : > { %v697_v39 = vadd.f32 %v1476_v35, %v326_v6  ;;  %v688_v41 = vpop.f32.mrb[11].mxu1 }
 0x163   : > { %v689_v43 = vadd.f32 %v688_v41, %v326_v6  ;;  %v1479_v44 = vpop.f32.mrb[12].mxu1  ;;  %1517 = vmatprep.subr.bf16.mxu0 %v1973_v31 }
 0x164   : > { %v1977_v46 = vpack.c.bf16 %v697_v39, %v694_v28  ;;  %v710_v47 = vadd.f32 %v1479_v44, %v326_v6  ;;  %v701_v48 = vpop.f32.mrb[13].mxu1  ;;  %1518 = vmatpush3.bf16.msra.mxu0 %v1973_v31 }
 0x165   : > { %v768_v50 = vpack.c.bf16 %v689_v43, %v686_v32  ;;  %v702_v52 = vadd.f32 %v701_v48, %v326_v6  ;;  %v1480_v55 = vpop.f32.mrb[14].mxu1  ;;  %1519 = vmatprep.subr.bf16.mxu0 %v1971_v26 }
 0x166   : > { %v713_v56 = vadd.f32 %v1480_v55, %v326_v6  ;;  %v704_v59 = vpop.f32.mrb[15].mxu1 }
 0x167   : > { %v705_v60 = vadd.f32 %v704_v59, %v326_v6 }
 0x168   : > { %v771_v62 = vpack.c.bf16 %v713_v56, %v710_v47  ;;  %1520 = vmatpush3.bf16.msra.mxu0 %v1971_v26 }
 0x169   : > { %v770_v1 = vpack.c.bf16 %v705_v60, %v702_v52  ;;  %1521 = vmatprep.subr.bf16.mxu0 %v768_v50 }
 0x16c   : > { %1522 = vmatpush3.bf16.msra.mxu0 %v768_v50 }
 0x16d   : > { %1523 = vmatprep.subr.bf16.mxu0 %v1977_v46 }
 0x170   : > { %1524 = vmatpush3.bf16.msra.mxu0 %v1977_v46 }
 0x171   : > { %1525 = vmatprep.subr.bf16.mxu0 %v770_v1 }
 0x174   : > { %1526 = vmatpush3.bf16.msra.mxu0 %v770_v1 }
 0x175   : > { %1527 = vmatprep.subr.bf16.mxu0 %v771_v62 }
 0x178   : > { %1528 = vmatpush3.bf16.msra.mxu0 %v771_v62 }
 0x1aa   : > { %v748_v2 = vpop.trf.xlu0 }
 0x1ab   : > { %1481 = vmatprep.subr.bf16.mxu1 %v748_v2 }
 0x1ac   : > { %1482 = vmatpush3.bf16.msra.mxu1 %v748_v2 }
 0x1ae   : > { %v749_v3 = vpop.trf.xlu0 }
 0x1af   : > { %1483 = vmatprep.subr.bf16.mxu1 %v749_v3 }
 0x1b0   : > { %1484 = vmatpush3.bf16.msra.mxu1 %v749_v3 }
 0x1b2   : > { %v750_v5 = vpop.trf.xlu0 }
 0x1b3   : > { %1485 = vmatprep.subr.bf16.mxu1 %v750_v5 }
 0x1b4   : > { %1486 = vmatpush3.bf16.msra.mxu1 %v750_v5 }
 0x1b6   : > { %v751_v6 = vpop.trf.xlu0 }
 0x1b7   : > { %1487 = vmatprep.subr.bf16.mxu1 %v751_v6 }
 0x1b8   : > { %1488 = vmatpush3.bf16.msra.mxu1 %v751_v6 }
 0x1ba   : > { %v752_v8 = vpop.trf.xlu0 }
 0x1bb   : > { %1489 = vmatprep.subr.bf16.mxu1 %v752_v8 }
 0x1bc   : > { %1490 = vmatpush3.bf16.msra.mxu1 %v752_v8 }
 0x1be   : > { %v753_v9 = vpop.trf.xlu0 }
 0x1bf   : > { %1491 = vmatprep.subr.bf16.mxu1 %v753_v9 }
 0x1c0   : > { %1492 = vmatpush3.bf16.msra.mxu1 %v753_v9 }
 0x1c2   : > { %v754_v38 = vpop.trf.xlu0 }
 0x1c3   : > { %1493 = vmatprep.subr.bf16.mxu1 %v754_v38 }
 0x1c4   : > { %1494 = vmatpush3.bf16.msra.mxu1 %v754_v38 }
 0x1c6   : > { %v755_v11 = vpop.trf.xlu0 }
 0x1c7   : > { %1495 = vmatprep.subr.bf16.mxu1 %v755_v11 }
 0x1c8   : > { %1496 = vmatpush3.bf16.msra.mxu1 %v755_v11 }
 0x1c9   : > { %1545 = vmatprep.subr.bf16.mxu1 %v1967_v19 }
 0x1cb   : > { %1498 = vmatmul.mubr.bf16.vlgmr.msra.gmra.mrb[16].mxu1 %v717_v58 }
 0x1cc   : > { %1501 = vmatprep.mubr.bf16.mxu1 %v718_v4  ;;  %1553 = vmatpush3.bf16.msra.mxu1 %v1967_v19 }
 0x1cd   : > { %1546 = vmatprep.subr.bf16.mxu1 %v1965_v18 }
 0x1d0   : > { %1554 = vmatpush3.bf16.msra.mxu1 %v1965_v18 }
 0x1d1   : > { %1547 = vmatprep.subr.bf16.mxu1 %v1973_v31 }
 0x1d3   : > { %1502 = vmatmul.mubr.bf16.gmra.mrb[20].mxu1 %v719_v14 }
 0x1d4   : > { %1505 = vmatprep.mubr.bf16.mxu1 %v720_v24  ;;  %1555 = vmatpush3.bf16.msra.mxu1 %v1973_v31 }
 0x1d5   : > { %1548 = vmatprep.subr.bf16.mxu1 %v1971_v26 }
 0x1d8   : > { %1556 = vmatpush3.bf16.msra.mxu1 %v1971_v26 }
 0x1d9   : > { %1549 = vmatprep.subr.bf16.mxu1 %v768_v50 }
 0x1db   : > { %1506 = vmatmul.mubr.bf16.gmra.mrb[24].mxu1 %v721_v37 }
 0x1dc   : > { %1509 = vmatprep.mubr.bf16.mxu1 %v722_v49  ;;  %1557 = vmatpush3.bf16.msra.mxu1 %v768_v50 }
 0x1dd   : > { %1550 = vmatprep.subr.bf16.mxu1 %v1977_v46 }
 0x1e0   : > { %1558 = vmatpush3.bf16.msra.mxu1 %v1977_v46 }
 0x1e1   : > { %1551 = vmatprep.subr.bf16.mxu1 %v770_v1 }
 0x1e3   : > { %1510 = vmatmul.mubr.bf16.gmra.mrb[28].mxu1 %v723_v63 }
 0x1e4   : > { %1559 = vmatpush3.bf16.msra.mxu1 %v770_v1 }
 0x1e5   : > { %1552 = vmatprep.subr.bf16.mxu1 %v771_v62 }
 0x1e8   : > { %1560 = vmatpush3.bf16.msra.mxu1 %v771_v62 }
 0x29e   : > { %v1499_v54 = vpop.f32.mrb[16].mxu1 }
 0x29f   : > { %v835_v58 = vpop.f32.mrb[17].mxu1  ;;  %v903_v61 = vsel %vm900_vm0, %v1499_v54, -1e+30 }
 0x2a0   : > { %921 = vmax.xlane.f32.xlu1 %v903_v61  ;;  %v1500_v0 = vpop.f32.mrb[18].mxu1  ;;  %v901_v7 = vsel %vm900_vm0, %v835_v58, -1e+30 }
 0x2a1   : > { %v838_v4 = vpop.f32.mrb[19].mxu1  ;;  %v904_v17 = vsel %vm900_vm0, %v1500_v0, -1e+30 }
 0x2a2   : > { %v902_v27 = vsel %vm900_vm0, %v838_v4, -1e+30 }
 0x2a4   : > { %917 = vmax.xlane.f32.xlu1 %v901_v7 }
 0x2a6   : > { %v1503_v10 = vpop.f32.mrb[20].mxu1 }
 0x2a7   : > { %v851_v14 = vpop.f32.mrb[21].mxu1  ;;  %v2027_v45 = vsel %vm900_vm0, %v1503_v10, -1e+30 }
 0x2a8   : > { %923 = vmax.xlane.f32.xlu1 %v904_v17  ;;  %v1504_v20 = vpop.f32.mrb[22].mxu1  ;;  %v905_v24 = vsel %vm900_vm0, %v851_v14, -1e+30 }
 0x2a9   : > { %925 = vmax.xlane.f32.xlu0 %v905_v24  ;;  %v854_v33 = vpop.f32.mrb[23].mxu1  ;;  %v2023_v30 = vsel %vm900_vm0, %v1504_v20, -1e+30 }
 0x2aa   : > { %v906_v57 = vsel %vm900_vm0, %v854_v33, -1e+30 }
 0x2ac   : > { %919 = vmax.xlane.f32.xlu1 %v902_v27 }
 0x2ad   : > { %931 = vmax.xlane.f32.xlu0 %v2023_v30 }
 0x2ae   : > { %v1507_v37 = vpop.f32.mrb[24].mxu1 }
 0x2af   : > { %v867_v42 = vpop.f32.mrb[25].mxu1  ;;  %v911_v13 = vsel %vm900_vm0, %v1507_v37, -1e+30 }
 0x2b0   : > { %929 = vmax.xlane.f32.xlu1 %v2027_v45  ;;  %v1508_v49 = vpop.f32.mrb[26].mxu1  ;;  %v909_v18 = vsel %vm900_vm0, %v867_v42, -1e+30 }
 0x2b1   : > { %v870_v53 = vpop.f32.mrb[27].mxu1  ;;  %v912_v19 = vsel %vm900_vm0, %v1508_v49, -1e+30 }
 0x2b2   : > { %v2039_v21 = vsel %vm900_vm0, %v870_v53, -1e+30 }
 0x2b4   : > { %927 = vmax.xlane.f32.xlu1 %v906_v57 }
 0x2b6   : > { %v1511_v63 = vpop.f32.mrb[28].mxu1 }
 0x2b7   : > { %v883_v12 = vpop.f32.mrb[29].mxu1  ;;  %v2051_v23 = vsel %vm900_vm0, %v1511_v63, -1e+30 }
 0x2b8   : > { %937 = vmax.xlane.f32.xlu1 %v911_v13  ;;  %v1512_v15 = vpop.f32.mrb[30].mxu1  ;;  %v2043_v22 = vsel %vm900_vm0, %v883_v12, -1e+30 }
 0x2b9   : > { %v886_v16 = vpop.f32.mrb[31].mxu1  ;;  %v2033_v40 = vsel %vm900_vm0, %v1512_v15, -1e+30 }
 0x2ba   : > { %947 = vmax.xlane.f32.xlu0 %v2033_v40  ;;  %v2047_v34 = vsel %vm900_vm0, %v886_v16, -1e+30 }
 0x2bc   : > { %933 = vmax.xlane.f32.xlu1 %v909_v18 }
 0x2c0   : > { %939 = vmax.xlane.f32.xlu1 %v912_v19 }
 0x2c4   : > { %935 = vmax.xlane.f32.xlu1 %v2039_v21 }
 0x2c8   : > { %941 = vmax.xlane.f32.xlu1 %v2043_v22 }
 0x2cc   : > { %943 = vmax.xlane.f32.xlu1 %v2047_v34 }
 0x2d0   : > { %945 = vmax.xlane.f32.xlu1 %v2051_v23 }
 0x32d   : > { %v922_v36 = vpop.xlane.xlu1 %921 }
 0x32e   : > { %v951_v25 = vsub.f32 %v903_v61, %v922_v36 }
 0x330   : > { %v969_v26 = vmul.f32 1.442695, %v951_v25 }
 0x331   : > { %v918_v28 = vpop.xlane.xlu1 %917 }
 0x332   : > { %1639 = vpow2.f32 %v969_v26  ;;  %v949_v29 = vsub.f32 %v901_v7, %v918_v28 }
 0x334   : > { %v965_v31 = vmul.f32 1.442695, %v949_v29 }
 0x335   : > { %v924_v32 = vpop.xlane.xlu1 %923 }
 0x336   : > { %1641 = vpow2.f32 %v965_v31  ;;  %v952_v35 = vsub.f32 %v904_v17, %v924_v32  ;;  %v926_v39 = vpop.xlane.xlu0 %925 }
 0x337   : > { %v953_v41 = vsub.f32 %v905_v24, %v926_v39 }
 0x338   : > { %v971_v43 = vmul.f32 1.442695, %v952_v35 }
 0x339   : > { %v973_v44 = vmul.f32 1.442695, %v953_v41  ;;  %v920_v46 = vpop.xlane.xlu1 %919 }
 0x33a   : > { %1643 = vpow2.f32 %v971_v43  ;;  %v950_v47 = vsub.f32 %v902_v27, %v920_v46  ;;  %v932_v58 = vpop.xlane.xlu0 %931 }
 0x33b   : > { %1645 = vpow2.f32 %v973_v44  ;;  %v956_v7 = vsub.f32 %v2023_v30, %v932_v58 }
 0x33c   : > { %v2054_v48 = vpop.eup %1639  ;;  %v967_v50 = vmul.f32 1.442695, %v950_v47 }
 0x33d   : > { %v930_v52 = vpop.xlane.xlu1 %929  ;;  %1001 = vadd.xlane.f32.xlu1 %v2054_v48  ;;  %v979_v24 = vmul.f32 1.442695, %v956_v7 }
 0x33e   : > { %1647 = vpow2.f32 %v967_v50  ;;  %v955_v8 = vsub.f32 %v2027_v45, %v930_v52 }
 0x340   : > { %v2057_v55 = vpop.eup %1641  ;;  %v977_v51 = vmul.f32 1.442695, %v955_v8 }
 0x341   : > { %v928_v56 = vpop.xlane.xlu1 %927  ;;  %997 = vadd.xlane.f32.xlu1 %v2057_v55 }
 0x342   : > { %v954_v59 = vsub.f32 %v906_v57, %v928_v56 }
 0x344   : > { %v2060_v60 = vpop.eup %1643  ;;  %v975_v62 = vmul.f32 1.442695, %v954_v59 }
 0x345   : > { %v2062_v1 = vpop.eup %1645  ;;  %v938_v2 = vpop.xlane.xlu1 %937  ;;  %1003 = vadd.xlane.f32.xlu0 %v2060_v60 }
 0x346   : > { %1649 = vpow2.f32 %v975_v62  ;;  %v959_v3 = vsub.f32 %v911_v13, %v938_v2  ;;  %1005 = vadd.xlane.f32.xlu1 %v2062_v1 }
 0x347   : > { %v948_v27 = vpop.xlane.xlu0 %947 }
 0x348   : > { %v2066_v5 = vpop.eup %1647  ;;  %v985_v6 = vmul.f32 1.442695, %v959_v3  ;;  %v964_v45 = vsub.f32 %v2033_v40, %v948_v27 }
 0x349   : > { %v934_v9 = vpop.xlane.xlu1 %933  ;;  %999 = vadd.xlane.f32.xlu0 %v2066_v5 }
 0x34a   : > { %1651 = vpow2.f32 %v985_v6  ;;  %v957_v38 = vsub.f32 %v909_v18, %v934_v9  ;;  %v995_v13 = vmul.f32 1.442695, %v964_v45 }
 0x34c   : > { %v981_v11 = vmul.f32 1.442695, %v957_v38 }
 0x34d   : > { %v940_v54 = vpop.xlane.xlu1 %939 }
 0x34e   : > { %1653 = vpow2.f32 %v981_v11  ;;  %v960_v61 = vsub.f32 %v912_v19, %v940_v54 }
 0x34f   : > { %1655 = vpow2.f32 %v977_v51 }
 0x350   : > { %v2070_v0 = vpop.eup %1649  ;;  %v987_v4 = vmul.f32 1.442695, %v960_v61 }
 0x351   : > { %v936_v10 = vpop.xlane.xlu1 %935  ;;  %1007 = vadd.xlane.f32.xlu0 %v2070_v0 }
 0x352   : > { %1657 = vpow2.f32 %v987_v4  ;;  %v958_v14 = vsub.f32 %v2039_v21, %v936_v10 }
 0x354   : > { %v2075_v17 = vpop.eup %1651  ;;  %v983_v20 = vmul.f32 1.442695, %v958_v14 }
 0x355   : > { %v942_v33 = vpop.xlane.xlu1 %941  ;;  %1017 = vadd.xlane.f32.xlu1 %v2075_v17 }
 0x356   : > { %1659 = vpow2.f32 %v983_v20  ;;  %v961_v37 = vsub.f32 %v2043_v22, %v942_v33 }
 0x357   : > { %1661 = vpow2.f32 %v979_v24 }
 0x358   : > { %v2079_v42 = vpop.eup %1653  ;;  %v989_v30 = vmul.f32 1.442695, %v961_v37 }
 0x359   : > { %1013 = vadd.xlane.f32.xlu1 %v2079_v42  ;;  %v944_v49 = vpop.xlane.xlu1 %943  ;;  %v2084_v57 = vpop.eup %1655 }
 0x35a   : > { %1663 = vpow2.f32 %v989_v30  ;;  %v962_v53 = vsub.f32 %v2047_v34, %v944_v49 }
 0x35c   : > { %v2086_v63 = vpop.eup %1657  ;;  %v991_v12 = vmul.f32 1.442695, %v962_v53 }
 0x35d   : > { %1019 = vadd.xlane.f32.xlu0 %v2086_v63  ;;  %1009 = vadd.xlane.f32.xlu1 %v2084_v57  ;;  %v946_v15 = vpop.xlane.xlu1 %945 }
 0x35e   : > { %1665 = vpow2.f32 %v991_v12  ;;  %v963_v16 = vsub.f32 %v2051_v23, %v946_v15 }
 0x35f   : > { %1667 = vpow2.f32 %v995_v13 }
 0x360   : > { %v2091_v40 = vpop.eup %1659  ;;  %v993_v18 = vmul.f32 1.442695, %v963_v16 }
 0x361   : > { %1015 = vadd.xlane.f32.xlu0 %v2091_v40  ;;  %v2094_v19 = vpop.eup %1661 }
 0x362   : > { %1669 = vpow2.f32 %v993_v18 }
 0x364   : > { %v2096_v21 = vpop.eup %1663 }
 0x365   : > { %1011 = vadd.xlane.f32.xlu0 %v2094_v19  ;;  %1021 = vadd.xlane.f32.xlu1 %v2096_v21 }
 0x368   : > { %v2100_v22 = vpop.eup %1665 }
 0x369   : > { %1023 = vadd.xlane.f32.xlu0 %v2100_v22  ;;  %v2103_v34 = vpop.eup %1667 }
 0x36c   : > { %v2105_v23 = vpop.eup %1669 }
 0x36d   : > { %1027 = vadd.xlane.f32.xlu0 %v2103_v34  ;;  %1025 = vadd.xlane.f32.xlu1 %v2105_v23 }
 0x3ca   : > { %v1002_v36 = vpop.xlane.xlu1 %1001 }
 0x3cb   : > { %1671 = vrcp.f32 %v1002_v36 }
 0x3ce   : > { %v998_v25 = vpop.xlane.xlu1 %997 }
 0x3cf   : > { %1673 = vrcp.f32 %v998_v25 }
 0x3d2   : > { %v1004_v26 = vpop.xlane.xlu0 %1003 }
 0x3d3   : > { %1675 = vrcp.f32 %v1004_v26  ;;  %v1006_v28 = vpop.xlane.xlu1 %1005 }
 0x3d4   : > { %1677 = vrcp.f32 %v1006_v28 }
 0x3d5   : > { %v1672_v29 = vpop.eup %1671 }
 0x3d6   : > { %v1047_v31 = vmul.f32 %v1672_v29, %v2054_v48  ;;  %v1000_v32 = vpop.xlane.xlu0 %999 }
 0x3d7   : > { %1679 = vrcp.f32 %v1000_v32 }
 0x3d8   : > { %1192 = vst [vmem:[%s2115_s24 + $0x10] sm:$0xff] %v1047_v31 }
 0x3d9   : > { %v1674_v35 = vpop.eup %1673 }
 0x3da   : > { %v1045_v39 = vmul.f32 %v1674_v35, %v2057_v55 }
 0x3dc   : > { %1190 = vst [vmem:[%s2115_s24] sm:$0xff] %v1045_v39 }
 0x3dd   : > { %v1676_v41 = vpop.eup %1675 }
 0x3de   : > { %v1678_v43 = vpop.eup %1677  ;;  %v1048_v44 = vmul.f32 %v1676_v41, %v2060_v60  ;;  %v1008_v46 = vpop.xlane.xlu0 %1007 }
 0x3df   : > { %1681 = vrcp.f32 %v1008_v46  ;;  %v1049_v47 = vmul.f32 %v1678_v43, %v2062_v1 }
 0x3e0   : > { %1193 = vst [vmem:[%s2115_s24 + $0x18] sm:$0xff] %v1048_v44  ;;  %v1062_v55 = vpack.c.bf16 %v1048_v44, %v1047_v31 }
 0x3e1   : > { %v1680_v50 = vpop.eup %1679  ;;  %1194 = vst [vmem:[%s2115_s24 + $0x20] sm:$0xff] %v1049_v47 }
 0x3e2   : > { %v1018_v48 = vpop.xlane.xlu1 %1017  ;;  %v1046_v52 = vmul.f32 %v1680_v50, %v2066_v5 }
 0x3e3   : > { %1683 = vrcp.f32 %v1018_v48 }
 0x3e4   : > { %v1061_v56 = vpack.c.bf16 %v1046_v52, %v1045_v39  ;;  %1191 = vst [vmem:[%s2115_s24 + $0x8] sm:$0xff] %v1046_v52 }
 0x3e6   : > { %1529 = vmatprep.mubr.bf16.mxu0 %v1061_v56  ;;  %v1014_v59 = vpop.xlane.xlu1 %1013 }
 0x3e7   : > { %1685 = vrcp.f32 %v1014_v59  ;;  %1530 = vmatmul.mubr.bf16.vlgmr.msra.gmra.mrb[32].mxu0 %v1062_v55 }
 0x3e9   : > { %v1682_v60 = vpop.eup %1681 }
 0x3ea   : > { %v1020_v62 = vpop.xlane.xlu0 %1019  ;;  %v1010_v2 = vpop.xlane.xlu1 %1009  ;;  %v1050_v1 = vmul.f32 %v1682_v60, %v2070_v0 }
 0x3eb   : > { %1687 = vrcp.f32 %v1020_v62 }
 0x3ec   : > { %1689 = vrcp.f32 %v1010_v2  ;;  %v1063_v3 = vpack.c.bf16 %v1050_v1, %v1049_v47  ;;  %1195 = vst [vmem:[%s2115_s24 + $0x28] sm:$0xff] %v1050_v1 }
 0x3ed   : > { %v1684_v5 = vpop.eup %1683 }
 0x3ee   : > { %v1055_v6 = vmul.f32 %v1684_v5, %v2075_v17  ;;  %v1016_v8 = vpop.xlane.xlu0 %1015  ;;  %1533 = vmatprep.mubr.bf16.mxu0 %v1063_v3 }
 0x3ef   : > { %1691 = vrcp.f32 %v1016_v8 }
 0x3f0   : > { %1200 = vst [vmem:[%s2115_s24 + $0x50] sm:$0xff] %v1055_v6 }
 0x3f1   : > { %v1686_v9 = vpop.eup %1685 }
 0x3f2   : > { %v1012_v38 = vpop.xlane.xlu0 %1011  ;;  %v1022_v11 = vpop.xlane.xlu1 %1021  ;;  %v1053_v51 = vmul.f32 %v1686_v9, %v2079_v42 }
 0x3f3   : > { %1693 = vrcp.f32 %v1012_v38 }
 0x3f4   : > { %1695 = vrcp.f32 %v1022_v11  ;;  %1198 = vst [vmem:[%s2115_s24 + $0x40] sm:$0xff] %v1053_v51 }
 0x3f5   : > { %v1688_v54 = vpop.eup %1687 }
 0x3f6   : > { %v1690_v58 = vpop.eup %1689  ;;  %v1056_v61 = vmul.f32 %v1688_v54, %v2086_v63  ;;  %v1024_v0 = vpop.xlane.xlu0 %1023 }
 0x3f7   : > { %1697 = vrcp.f32 %v1024_v0  ;;  %v1051_v4 = vmul.f32 %v1690_v58, %v2084_v57 }
 0x3f8   : > { %1201 = vst [vmem:[%s2115_s24 + $0x58] sm:$0xff] %v1056_v61  ;;  %v1066_v33 = vpack.c.bf16 %v1056_v61, %v1055_v6 }
 0x3f9   : > { %v1692_v7 = vpop.eup %1691  ;;  %1196 = vst [vmem:[%s2115_s24 + $0x30] sm:$0xff] %v1051_v4 }
 0x3fa   : > { %v1028_v10 = vpop.xlane.xlu0 %1027  ;;  %v1026_v14 = vpop.xlane.xlu1 %1025  ;;  %v1054_v17 = vmul.f32 %v1692_v7, %v2091_v40 }
 0x3fb   : > { %1699 = vrcp.f32 %v1028_v10 }
 0x3fc   : > { %1701 = vrcp.f32 %v1026_v14  ;;  %v1065_v20 = vpack.c.bf16 %v1054_v17, %v1053_v51  ;;  %1199 = vst [vmem:[%s2115_s24 + $0x48] sm:$0xff] %v1054_v17 }
 0x3fd   : > { %v1694_v24 = vpop.eup %1693 }
 0x3fe   : > { %v1696_v27 = vpop.eup %1695  ;;  %1537 = vmatprep.mubr.bf16.mxu1 %v1065_v20  ;;  %v1052_v37 = vmul.f32 %v1694_v24, %v2094_v19 }
 0x3ff   : > { %1538 = vmatmul.mubr.bf16.vlgmr.msra.gmra.mrb[32].mxu1 %v1066_v33  ;;  %v1057_v42 = vmul.f32 %v1696_v27, %v2096_v21 }
 0x400   : > { %v1064_v30 = vpack.c.bf16 %v1052_v37, %v1051_v4  ;;  %1197 = vst [vmem:[%s2115_s24 + $0x38] sm:$0xff] %v1052_v37 }
 0x401   : > { %v1698_v45 = vpop.eup %1697  ;;  %1202 = vst [vmem:[%s2115_s24 + $0x60] sm:$0xff] %v1057_v42 }
 0x402   : > { %1534 = vmatmul.mubr.bf16.gmra.mrb[36].mxu0 %v1064_v30  ;;  %v1058_v49 = vmul.f32 %v1698_v45, %v2100_v22 }
 0x404   : > { %v1067_v53 = vpack.c.bf16 %v1058_v49, %v1057_v42  ;;  %1203 = vst [vmem:[%s2115_s24 + $0x68] sm:$0xff] %v1058_v49 }
 0x405   : > { %v1700_v57 = vpop.eup %1699 }
 0x406   : > { %v1702_v63 = vpop.eup %1701  ;;  %1541 = vmatprep.mubr.bf16.mxu1 %v1067_v53  ;;  %v1060_v12 = vmul.f32 %v1700_v57, %v2103_v34 }
 0x407   : > { %v1059_v13 = vmul.f32 %v1702_v63, %v2105_v23 }
 0x408   : > { %1205 = vst [vmem:[%s2115_s24 + $0x78] sm:$0xff] %v1060_v12 }
 0x409   : > { %v1068_v15 = vpack.c.bf16 %v1060_v12, %v1059_v13  ;;  %1204 = vst [vmem:[%s2115_s24 + $0x70] sm:$0xff] %v1059_v13 }
 0x40b   : > { %1542 = vmatmul.mubr.bf16.gmra.mrb[36].mxu1 %v1068_v15 }
 0x4ba   : > { %v1531_v16 = vpop.f32.mrb[32].mxu0 }
 0x4bb   : > { %1176 = vst [vmem:[%s2154_s27 + $0x10] sm:$0xff] %v1531_v16  ;;  %v1111_v40 = vpop.f32.mrb[33].mxu0 }
 0x4bc   : > { %1174 = vst [vmem:[%s2154_s27] sm:$0xff] %v1111_v40  ;;  %v1532_v18 = vpop.f32.mrb[34].mxu0 }
 0x4bd   : > { %1177 = vst [vmem:[%s2154_s27 + $0x18] sm:$0xff] %v1532_v18  ;;  %v1114_v19 = vpop.f32.mrb[35].mxu0 }
 0x4be   : > { %1175 = vst [vmem:[%s2154_s27 + $0x8] sm:$0xff] %v1114_v19 }
 0x4d2   : > { %v1539_v21 = vpop.f32.mrb[32].mxu1 }
 0x4d3   : > { %1184 = vst [vmem:[%s2154_s27 + $0x50] sm:$0xff] %v1539_v21  ;;  %v1143_v22 = vpop.f32.mrb[33].mxu1 }
 0x4d4   : > { %1182 = vst [vmem:[%s2154_s27 + $0x40] sm:$0xff] %v1143_v22  ;;  %v1540_v34 = vpop.f32.mrb[34].mxu1 }
 0x4d5   : > { %1185 = vst [vmem:[%s2154_s27 + $0x58] sm:$0xff] %v1540_v34  ;;  %v1535_v23 = vpop.f32.mrb[36].mxu0  ;;  %v1146_v36 = vpop.f32.mrb[35].mxu1 }
 0x4d6   : > { %1180 = vst [vmem:[%s2154_s27 + $0x30] sm:$0xff] %v1535_v23  ;;  %1183 = vst [vmem:[%s2154_s27 + $0x48] sm:$0xff] %v1146_v36  ;;  %v1127_v25 = vpop.f32.mrb[37].mxu0 }
 0x4d7   : > { %1178 = vst [vmem:[%s2154_s27 + $0x20] sm:$0xff] %v1127_v25  ;;  %v1536_v26 = vpop.f32.mrb[38].mxu0 }
 0x4d8   : > { %1181 = vst [vmem:[%s2154_s27 + $0x38] sm:$0xff] %v1536_v26  ;;  %v1130_v28 = vpop.f32.mrb[39].mxu0 }
 0x4d9   : > { %1179 = vst [vmem:[%s2154_s27 + $0x28] sm:$0xff] %v1130_v28 }
 0x4de   : > { %v1543_v29 = vpop.f32.mrb[36].mxu1 }
 0x4df   : > { %1188 = vst [vmem:[%s2154_s27 + $0x70] sm:$0xff] %v1543_v29  ;;  %v1159_v31 = vpop.f32.mrb[37].mxu1 }
 0x4e0   : > { %1186 = vst [vmem:[%s2154_s27 + $0x60] sm:$0xff] %v1159_v31  ;;  %v1544_v32 = vpop.f32.mrb[38].mxu1 }
 0x4e1   : > { %1189 = vst [vmem:[%s2154_s27 + $0x78] sm:$0xff] %v1544_v32  ;;  %v1162_v35 = vpop.f32.mrb[39].mxu1 }
 0x4e2   : > { %1187 = vst [vmem:[%s2154_s27 + $0x68] sm:$0xff] %v1162_v35 }
 0x4e3 PF: > { %s16_s17 = sadd.s32 1, %s1757_s17   ;;  %s2194_s15 = smov %s1753_s16 }
 0x4e4   : > { %p13_p4 = scmp.ge.s32.totalorder %s16_s17, 4   ;;  %s2195_s16 = smov %s2197_s19 }
 0x4e6   :  { %15 = sbr.rel (!%p13_p4) target bundleno = 2 (0x2), region = 84 }
 0x4ed   :  { %1261 = vsyncpa [#allocation6], 1 }
 0x4ee   :  { %1263 = vsyncpa [#allocation6 + $0x1], 1 }

</bundles_post_ra>
